<compile_context>
chip_gen: v6e
topology: v6e:2x2x1
jax: 0.10.0
libtpu: 0.0.40
codegen_flags: <defaults>
</compile_context>

<pallas_src>
import jax
import jax.numpy as jnp
from jax.experimental import pallas as pl
from jax.experimental.pallas import tpu as pltpu


def _round_up(n, m):
    return ((n + m - 1) // m) * m


def _mxu_quantum():
    """256x256 MXU on v6e/v7x; 128-wide systolic tiles on v5e and earlier."""
    try:
        kind = jax.devices()[0].device_kind.lower()
    except Exception:
        return 128
    for tag in ("v2", "v3", "v4", "v5"):
        if tag in kind:
            return 128
    return 256


def _vmem_capacity_bytes():
    try:
        return int(pltpu.get_tpu_info().vmem_capacity_bytes)
    except Exception:
        return 64 << 20  # conservative (v7x per-TC VMEM)


def _pick_batch_tile(B):
    """Largest tile that still leaves >=2 grid steps; prefer exact divisors of B."""
    candidates = (1024, 512, 256, 128, 64, 32, 16)
    for tb in candidates:            # no batch pad, no row-slice copy
        if B >= 2 * tb and B % tb == 0:
            return tb
    for tb in candidates:            # still >=2 tiles (v7x megacore split)
        if B >= 2 * tb:
            return tb
    return _round_up(max(B, 8), 8)   # tiny batch: single tile


def _mlp_kernel(x_ref, w1_ref, w2_ref, w3_ref, w4_ref, b_ref, o_ref):
    Hp = w1_ref.shape[1]          # padded hidden width
    Cp = o_ref.shape[1]           # padded logits width (>= 128)
    bias = b_ref[...]             # (4, Wb) f32, VMEM-resident

    # fc1 + ReLU   (dropout1 = identity in eval mode)
    h = jnp.dot(x_ref[...].astype(jnp.bfloat16), w1_ref[...],
                preferred_element_type=jnp.float32)
    h = jnp.maximum(h + bias[0:1, :Hp], 0.0)
    # fc2 + ReLU   (dropout2 = identity in eval mode)
    h = jnp.dot(h.astype(jnp.bfloat16), w2_ref[...],
                preferred_element_type=jnp.float32)
    h = jnp.maximum(h + bias[1:2, :Hp], 0.0)
    # fc3 + ReLU   (dropout3 = identity in eval mode)
    h = jnp.dot(h.astype(jnp.bfloat16), w3_ref[...],
                preferred_element_type=jnp.float32)
    h = jnp.maximum(h + bias[2:3, :Hp], 0.0)
    # fc4 (logits, no activation)
    out = jnp.dot(h.astype(jnp.bfloat16), w4_ref[...],
                  preferred_element_type=jnp.float32)
    o_ref[...] = (out + bias[3:4, :Cp]).astype(o_ref.dtype)


def prepare_params(params):
    """One-time prep: pad/cast weights to bf16, pack biases. Cache the result."""
    in_features, H = params["w1"].shape
    C = params["w4"].shape[1]
    q = _mxu_quantum()
    Kp = _round_up(max(in_features, 128), 128)
    Hp = _round_up(max(H, q), q)          # 256-multiples on v6e/v7x, 128 on v5e
    Cp = _round_up(max(C, 128), 128)
    Wb = max(Hp, Cp)

    def padw(w, r, c):
        return jnp.pad(w, ((0, r - w.shape[0]), (0, c - w.shape[1]))).astype(jnp.bfloat16)

    bias = jnp.zeros((4, Wb), jnp.float32)
    bias = bias.at[0, :H].set(params["b1"].reshape(-1))
    bias = bias.at[1, :H].set(params["b2"].reshape(-1))
    bias = bias.at[2, :H].set(params["b3"].reshape(-1))
    bias = bias.at[3, :C].set(params["b4"].reshape(-1))

    return {
        "w1": padw(params["w1"], Kp, Hp),
        "w2": padw(params["w2"], Hp, Hp),
        "w3": padw(params["w3"], Hp, Hp),
        "w4": padw(params["w4"], Hp, Cp),
        "bias": bias,
        "dims": (in_features, H, C, Kp, Hp, Cp, Wb),
    }


def bird_classification_net(x, prep):
    """x: (B, input_size) f32 (or bf16). prep: output of prepare_params()."""
    in_features, H, C, Kp, Hp, Cp, Wb = prep["dims"]
    B = x.shape[0]
    assert x.shape[1] == in_features

    TB = _pick_batch_tile(B)
    Bp = _round_up(B, TB)
    grid = (Bp // TB,)

    if Bp != B or Kp != in_features:
        # Padding is required anyway: fold the bf16 cast into it so the only
        # streamed input is read from HBM at half width.
        x_in = jnp.pad(x.astype(jnp.bfloat16),
                       ((0, Bp - B), (0, Kp - in_features)))
    else:
        # Already aligned: pass through untouched (no standalone cast op);
        # the kernel casts at the dot input.
        x_in = x

    bpe_x = x_in.dtype.itemsize
    weight_bytes = (Kp * Hp + 2 * Hp * Hp + Hp * Cp) * 2 + 4 * Wb * 4
    stream_bytes = 2 * TB * Kp * bpe_x + 2 * TB * Cp * 4   # double-buffered x / out
    act_bytes = 2 * TB * max(Hp, Cp) * 4                   # activation temporaries
    vmem_bytes = int(min(2 * (weight_bytes + stream_bytes + act_bytes) + (4 << 20),
                         (_vmem_capacity_bytes() * 3) // 4))

    flops = 2 * Bp * (Kp * Hp + 2 * Hp * Hp + Hp * Cp)
    bytes_accessed = x_in.size * bpe_x + weight_bytes + Bp * Cp * 4

    out = pl.pallas_call(
        _mlp_kernel,
        out_shape=jax.ShapeDtypeStruct((Bp, Cp), jnp.float32),
        grid_spec=pltpu.PrefetchScalarGridSpec(
            num_scalar_prefetch=0,
            grid=grid,
            in_specs=[
                # streaming batch tile (double-buffered by the pipeline)
                pl.BlockSpec((TB, Kp), lambda i: (i, 0)),
                # weights + packed bias: VMEM-resident across all grid steps
                pl.BlockSpec((Kp, Hp), lambda i: (0, 0)),
                pl.BlockSpec((Hp, Hp), lambda i: (0, 0)),
                pl.BlockSpec((Hp, Hp), lambda i: (0, 0)),
                pl.BlockSpec((Hp, Cp), lambda i: (0, 0)),
                pl.BlockSpec((4, Wb), lambda i: (0, 0)),
            ],
            out_specs=pl.BlockSpec((TB, Cp), lambda i: (i, 0)),
        ),
        compiler_params=pltpu.CompilerParams(
            dimension_semantics=("parallel",),   # megacore split on v7x
            vmem_limit_bytes=vmem_bytes,
        ),
        cost_estimate=pl.CostEstimate(flops=int(flops), transcendentals=0,
                                      bytes_accessed=int(bytes_accessed)),
    )(x_in, prep["w1"], prep["w2"], prep["w3"], prep["w4"], prep["bias"])

    return out[:B, :C]


def init_params(key, input_size, hidden_size, num_classes):
    """nn.Linear-style init (uniform +/- 1/sqrt(fan_in)); weights stored as W^T."""
    dims = [(input_size, hidden_size),
            (hidden_size, hidden_size),
            (hidden_size, hidden_size),
            (hidden_size, num_classes)]
    params = {}
    for i, (fan_in, fan_out) in enumerate(dims, start=1):
        key, kw, kb = jax.random.split(key, 3)
        bound = 1.0 / (fan_in ** 0.5)
        params[f"w{i}"] = jax.random.uniform(
            kw, (fan_in, fan_out), jnp.float32, -bound, bound)
        params[f"b{i}"] = jax.random.uniform(
            kb, (1, fan_out), jnp.float32, -bound, bound)
    return params


def reference_forward(x, params):
    """Reference with the same numerics as the kernel: bf16 dot inputs, f32 accum."""
    def dot(a, b):
        return jnp.dot(a.astype(jnp.bfloat16), b.astype(jnp.bfloat16),
                       preferred_element_type=jnp.float32)
    h = jnp.maximum(dot(x, params["w1"]) + params["b1"], 0.0)
    h = jnp.maximum(dot(h, params["w2"]) + params["b2"], 0.0)
    h = jnp.maximum(dot(h, params["w3"]) + params["b3"], 0.0)
    return dot(h, params["w4"]) + params["b4"]


if __name__ == "__main__":
    # Small shapes consistent with the module: padded-sequence features in,
    # hidden MLP, 18 bird classes out.
    batch = 8
    input_size = 128     # padded max sequence length (input_data.size(1))
    hidden_size = 32     # small stand-in for 512
    num_classes = 18     # len(etiquetas_numericas)

    key = jax.random.PRNGKey(0)
    key, kx = jax.random.split(key)
    x = jax.random.normal(kx, (batch, input_size), jnp.float32)
    params = init_params(key, input_size, hidden_size, num_classes)
    prep = prepare_params(params)    # one-time weight repack (hoisted out of forward)

    out = jax.block_until_ready(bird_classification_net(x, prep))
    ref = reference_forward(x, params)

    assert out.shape == (batch, num_classes)
    assert jnp.allclose(out, ref, atol=1e-2, rtol=1e-2), \
        float(jnp.max(jnp.abs(out - ref)))
    print("KERNEL_OK")
</pallas_src>

<mosaic_0001>
module attributes {stable_mosaic.version = 11 : i64} {
  func.func @_mlp_kernel(%arg0: i32, %arg1: memref<8x128xf32, #tpu.memory_space<vmem>>, %arg2: memref<128x256xbf16, #tpu.memory_space<vmem>>, %arg3: memref<256x256xbf16, #tpu.memory_space<vmem>>, %arg4: memref<256x256xbf16, #tpu.memory_space<vmem>>, %arg5: memref<256x128xbf16, #tpu.memory_space<vmem>>, %arg6: memref<4x256xf32, #tpu.memory_space<vmem>>, %arg7: memref<8x128xf32, #tpu.memory_space<vmem>>) attributes {dimension_semantics = [#tpu.dimension_semantics<parallel>], iteration_bounds = array<i64: 1>, scalar_prefetch = 0 : i64, scratch_operands = 0 : i64, tpu.core_type = #tpu.core_type<tc>, window_params = [{transform_indices = @transform_0, window_bounds = array<i64: 8, 128>}, {pipeline_mode = #tpu.pipeline_mode<synchronous>, transform_indices = @transform_1, window_bounds = array<i64: 128, 256>}, {pipeline_mode = #tpu.pipeline_mode<synchronous>, transform_indices = @transform_2, window_bounds = array<i64: 256, 256>}, {pipeline_mode = #tpu.pipeline_mode<synchronous>, transform_indices = @transform_3, window_bounds = array<i64: 256, 256>}, {pipeline_mode = #tpu.pipeline_mode<synchronous>, transform_indices = @transform_4, window_bounds = array<i64: 256, 128>}, {pipeline_mode = #tpu.pipeline_mode<synchronous>, transform_indices = @transform_5, window_bounds = array<i64: 4, 256>}, {transform_indices = @transform_6, window_bounds = array<i64: 8, 128>}]} {
    %c0 = arith.constant 0 : index
    %c0_0 = arith.constant 0 : index
    %0 = vector.load %arg6[%c0, %c0_0] : memref<4x256xf32, #tpu.memory_space<vmem>>, vector<4x256xf32>
    %c0_1 = arith.constant 0 : index
    %c0_2 = arith.constant 0 : index
    %1 = vector.load %arg1[%c0_1, %c0_2] : memref<8x128xf32, #tpu.memory_space<vmem>>, vector<8x128xf32>
    %2 = arith.truncf %1 : vector<8x128xf32> to vector<8x128xbf16>
    %c0_3 = arith.constant 0 : index
    %c0_4 = arith.constant 0 : index
    %3 = vector.load %arg2[%c0_3, %c0_4] : memref<128x256xbf16, #tpu.memory_space<vmem>>, vector<128x256xbf16>
    %cst = arith.constant dense<0.000000e+00> : vector<8x256xf32>
    %4 = tpu.matmul %2, %3, %cst {dimension_numbers = #tpu.dot_dimension_numbers<[1], [0], [0], [1], [0, 0, 1, 1], [], []>} : vector<8x128xbf16>, vector<128x256xbf16>, vector<8x256xf32> -> vector<8x256xf32>
    %5 = vector.extract_strided_slice %0 {offsets = [0, 0], sizes = [1, 256], strides = [1, 1]} : vector<4x256xf32> to vector<1x256xf32>
    %6 = vector.broadcast %5 : vector<1x256xf32> to vector<8x256xf32>
    %7 = arith.addf %4, %6 : vector<8x256xf32>
    %cst_5 = arith.constant 0.000000e+00 : f32
    %8 = vector.broadcast %cst_5 : f32 to vector<8x256xf32>
    %9 = arith.maximumf %7, %8 : vector<8x256xf32>
    %10 = arith.truncf %9 : vector<8x256xf32> to vector<8x256xbf16>
    %c0_6 = arith.constant 0 : index
    %c0_7 = arith.constant 0 : index
    %11 = vector.load %arg3[%c0_6, %c0_7] : memref<256x256xbf16, #tpu.memory_space<vmem>>, vector<256x256xbf16>
    %cst_8 = arith.constant dense<0.000000e+00> : vector<8x256xf32>
    %12 = tpu.matmul %10, %11, %cst_8 {dimension_numbers = #tpu.dot_dimension_numbers<[1], [0], [0], [1], [0, 0, 1, 1], [], []>} : vector<8x256xbf16>, vector<256x256xbf16>, vector<8x256xf32> -> vector<8x256xf32>
    %13 = vector.extract_strided_slice %0 {offsets = [1, 0], sizes = [1, 256], strides = [1, 1]} : vector<4x256xf32> to vector<1x256xf32>
    %14 = vector.broadcast %13 : vector<1x256xf32> to vector<8x256xf32>
    %15 = arith.addf %12, %14 : vector<8x256xf32>
    %cst_9 = arith.constant 0.000000e+00 : f32
    %16 = vector.broadcast %cst_9 : f32 to vector<8x256xf32>
    %17 = arith.maximumf %15, %16 : vector<8x256xf32>
    %18 = arith.truncf %17 : vector<8x256xf32> to vector<8x256xbf16>
    %c0_10 = arith.constant 0 : index
    %c0_11 = arith.constant 0 : index
    %19 = vector.load %arg4[%c0_10, %c0_11] : memref<256x256xbf16, #tpu.memory_space<vmem>>, vector<256x256xbf16>
    %cst_12 = arith.constant dense<0.000000e+00> : vector<8x256xf32>
    %20 = tpu.matmul %18, %19, %cst_12 {dimension_numbers = #tpu.dot_dimension_numbers<[1], [0], [0], [1], [0, 0, 1, 1], [], []>} : vector<8x256xbf16>, vector<256x256xbf16>, vector<8x256xf32> -> vector<8x256xf32>
    %21 = vector.extract_strided_slice %0 {offsets = [2, 0], sizes = [1, 256], strides = [1, 1]} : vector<4x256xf32> to vector<1x256xf32>
    %22 = vector.broadcast %21 : vector<1x256xf32> to vector<8x256xf32>
    %23 = arith.addf %20, %22 : vector<8x256xf32>
    %cst_13 = arith.constant 0.000000e+00 : f32
    %24 = vector.broadcast %cst_13 : f32 to vector<8x256xf32>
    %25 = arith.maximumf %23, %24 : vector<8x256xf32>
    %26 = arith.truncf %25 : vector<8x256xf32> to vector<8x256xbf16>
    %c0_14 = arith.constant 0 : index
    %c0_15 = arith.constant 0 : index
    %27 = vector.load %arg5[%c0_14, %c0_15] : memref<256x128xbf16, #tpu.memory_space<vmem>>, vector<256x128xbf16>
    %cst_16 = arith.constant dense<0.000000e+00> : vector<8x128xf32>
    %28 = tpu.matmul %26, %27, %cst_16 {dimension_numbers = #tpu.dot_dimension_numbers<[1], [0], [0], [1], [0, 0, 1, 1], [], []>} : vector<8x256xbf16>, vector<256x128xbf16>, vector<8x128xf32> -> vector<8x128xf32>
    %29 = vector.extract_strided_slice %0 {offsets = [3, 0], sizes = [1, 128], strides = [1, 1]} : vector<4x256xf32> to vector<1x128xf32>
    %30 = vector.broadcast %29 : vector<1x128xf32> to vector<8x128xf32>
    %31 = arith.addf %28, %30 : vector<8x128xf32>
    %c0_17 = arith.constant 0 : index
    %c0_18 = arith.constant 0 : index
    %32 = vector.load %arg7[%c0_17, %c0_18] : memref<8x128xf32, #tpu.memory_space<vmem>>, vector<8x128xf32>
    tpu.vector_store %arg7[%c0_17, %c0_18], %31 {strides = array<i32>} : memref<8x128xf32, #tpu.memory_space<vmem>>, vector<8x128xf32>,
    return
  }
  func.func @transform_0(%arg0: i32) -> (i32, i32) {
    %c0_i32 = arith.constant 0 : i32
    %c0_i32_0 = arith.constant 0 : i32
    return %arg0, %c0_i32 : i32, i32
  }
  func.func @transform_1(%arg0: i32) -> (i32, i32) {
    %c0_i32 = arith.constant 0 : i32
    %c0_i32_0 = arith.constant 0 : i32
    %c0_i32_1 = arith.constant 0 : i32
    return %c0_i32, %c0_i32_0 : i32, i32
  }
  func.func @transform_2(%arg0: i32) -> (i32, i32) {
    %c0_i32 = arith.constant 0 : i32
    %c0_i32_0 = arith.constant 0 : i32
    %c0_i32_1 = arith.constant 0 : i32
    return %c0_i32, %c0_i32_0 : i32, i32
  }
  func.func @transform_3(%arg0: i32) -> (i32, i32) {
    %c0_i32 = arith.constant 0 : i32
    %c0_i32_0 = arith.constant 0 : i32
    %c0_i32_1 = arith.constant 0 : i32
    return %c0_i32, %c0_i32_0 : i32, i32
  }
  func.func @transform_4(%arg0: i32) -> (i32, i32) {
    %c0_i32 = arith.constant 0 : i32
    %c0_i32_0 = arith.constant 0 : i32
    %c0_i32_1 = arith.constant 0 : i32
    return %c0_i32, %c0_i32_0 : i32, i32
  }
  func.func @transform_5(%arg0: i32) -> (i32, i32) {
    %c0_i32 = arith.constant 0 : i32
    %c0_i32_0 = arith.constant 0 : i32
    %c0_i32_1 = arith.constant 0 : i32
    return %c0_i32, %c0_i32_0 : i32, i32
  }
  func.func @transform_6(%arg0: i32) -> (i32, i32) {
    %c0_i32 = arith.constant 0 : i32
    %c0_i32_0 = arith.constant 0 : i32
    return %arg0, %c0_i32 : i32, i32
  }
}

</mosaic_0001>

<bundles_post_ra>
// kernel: tpu_custom_call.1
= control target key start
LH: loop header
LB: loop body
LE: loop exit
PB: predicated region body
PF: predicated region fallthrough
CT: control target
= control target key end

     0   :  { %11 = vsyncpa [#allocation3], 0  ;;  %s1441_s0 = inlined_call_operand.hbm [shape: f32[8,128], index: 0, kind: input, shape index: {}]   ;;  %s1442_s1 = inlined_call_operand.hbm [shape: bf16[128,256], index: 1, kind: input, shape index: {}]   ;;  %s1443_s2 = inlined_call_operand.hbm [shape: bf16[256,256], index: 2, kind: input, shape index: {}]   ;;  %s1444_s3 = inlined_call_operand.hbm [shape: bf16[256,256], index: 3, kind: input, shape index: {}]   ;;  %s1445_s4 = inlined_call_operand.hbm [shape: bf16[256,128], index: 4, kind: input, shape index: {}]   ;;  %s1446_s5 = inlined_call_operand.vmem [shape: f32[4,256], index: 5, kind: input, shape index: {}]   ;;  %s1447_s6 = inlined_call_operand.hbm [shape: f32[8,128], index: 6, kind: output, shape index: {}]  }
   0x1   :  { %12 = vsyncpa [#allocation6], 0 }
   0x2   :  { %13 = vsyncpa [#allocation9], 0 }
   0x3   :  { %14 = vsyncpa [#allocation4], 0  ;;  %s1347_s21 = smov [#allocation5]  }
   0x4   :  { %s30_s22 = sshll.u32 %s1347_s21, 4  ;;  %s31_s22 = int_to_ptr.vmem [resolvable:$true] %s30_s22 }
   0x5   :  { %s1227_s23 = scalar_lea.vmem %s31_s22, 2048  ;;  %p1232_p1 = scmp.lt.s32.totalorder %s31_s22, %s31_s22 }
   0x6   :  { %p1228_p0 = scmp.ne.s32.totalorder %s31_s22, %s1227_s23  ;;  %p1233_p2 = scmp.lt.s32.totalorder %s1227_s23, %s1227_s23 }
   0x8   :  { %p1234_p3 = por %p1233_p2, %p1232_p1 }
   0xa   :  { %p1235_p4 = pnand %p1234_p3, %p1228_p0 }
   0xc   :  { %1238 = shalt.err (!%p1235_p4)
}
   0xd   :  { %s1348_s24 = smov 128   ;;  %s1349_s25 = smov 8  }
   0xe   :  { %36 = dma.hbm_to_vmem [thread:$0]  %s1442_s1, 2048, %s31_s22, [#allocation6], %s1348_s24, %s1348_s24, %s1349_s25  }
   0xf   :  { %s1350_s28 = smov [#allocation8]   ;;  %s1351_s30 = smov [#allocation2]  }
  0x10   :  { %s54_s29 = sshll.u32 %s1350_s28, 4  ;;  %s21_s7 = sshll.u32 %s1351_s30, 4  ;;  %s55_s29 = int_to_ptr.vmem [resolvable:$true] %s54_s29  ;;  %s22_s7 = int_to_ptr.vmem [resolvable:$true] %s21_s7 }
  0x11   :  { %s1247_s8 = scalar_lea.vmem %s55_s29, 4096  ;;  %p1252_p6 = scmp.lt.s32.totalorder %s55_s29, %s55_s29 }
  0x12   :  { %p1248_p5 = scmp.ne.s32.totalorder %s55_s29, %s1247_s8  ;;  %p1253_p7 = scmp.lt.s32.totalorder %s1247_s8, %s1247_s8 }
  0x14   :  { %p1254_p8 = por %p1253_p7, %p1252_p6 }
  0x16   :  { %p1255_p9 = pnand %p1254_p8, %p1248_p5 }
  0x18   :  { %1258 = shalt.err (!%p1255_p9)
}
  0x19   :  { %60 = dma.hbm_to_vmem [thread:$0]  %s1444_s3, 4096, %s55_s29, [#allocation9], %s1348_s24, %s1348_s24, %s1349_s25  }
  0x1a   :  { %s1267_s1 = scalar_lea.vmem %s22_s7, 128  ;;  %p1272_p11 = scmp.lt.s32.totalorder %s22_s7, %s22_s7 }
  0x1b   :  { %p1268_p10 = scmp.ne.s32.totalorder %s22_s7, %s1267_s1  ;;  %p1273_p12 = scmp.lt.s32.totalorder %s1267_s1, %s1267_s1 }
  0x1d   :  { %p1274_p13 = por %p1273_p12, %p1272_p11 }
  0x1f   :  { %p1275_p0 = pnand %p1274_p13, %p1268_p10 }
  0x21   :  { %1278 = shalt.err (!%p1275_p0)
}
  0x22   :  { %24 = dma.hbm_to_vmem [thread:$0]  %s1441_s0, 128, %s22_s7, [#allocation3]  }
  0x23   :  { %s1352_s13 = smov [#allocation7]   ;;  %s1353_s15 = smov [#allocation10]  }
  0x24   :  { %s42_s14 = sshll.u32 %s1352_s13, 4  ;;  %s66_s16 = sshll.u32 %s1353_s15, 4  ;;  %s43_s14 = int_to_ptr.vmem [resolvable:$true] %s42_s14  ;;  %s67_s16 = int_to_ptr.vmem [resolvable:$true] %s66_s16 }
  0x25   :  { %s1287_s17 = scalar_lea.vmem %s43_s14, 4096  ;;  %p1292_p2 = scmp.lt.s32.totalorder %s43_s14, %s43_s14 }
  0x26   :  { %p1288_p1 = scmp.ne.s32.totalorder %s43_s14, %s1287_s17  ;;  %p1293_p3 = scmp.lt.s32.totalorder %s1287_s17, %s1287_s17 }
  0x28   :  { %p1294_p4 = por %p1293_p3, %p1292_p2 }
  0x2a   :  { %p1295_p5 = pnand %p1294_p4, %p1288_p1 }
  0x2c   :  { %1298 = shalt.err (!%p1295_p5)
}
  0x2d   :  { %48 = dma.hbm_to_vmem [thread:$0]  %s1443_s2, 4096, %s43_s14, [#allocation6], %s1348_s24, %s1348_s24, %s1349_s25  }
  0x2e   :  { %s1307_s0 = scalar_lea.vmem %s67_s16, 2048  ;;  %p1312_p7 = scmp.lt.s32.totalorder %s67_s16, %s67_s16 }
  0x2f   :  { %p1308_p6 = scmp.ne.s32.totalorder %s67_s16, %s1307_s0  ;;  %p1313_p8 = scmp.lt.s32.totalorder %s1307_s0, %s1307_s0 }
  0x31   :  { %p1314_p9 = por %p1313_p8, %p1312_p7 }
  0x33   :  { %p1315_p10 = pnand %p1314_p9, %p1308_p6 }
  0x35   :  { %1318 = shalt.err (!%p1315_p10)
}
  0x36   :  { %s1354_s19 = smov 64   ;;  %s1355_s20 = smov 4  }
  0x37   :  { %72 = dma.hbm_to_vmem [thread:$0]  %s1445_s4, 2048, %s67_s16, [#allocation9], %s1354_s19, %s1354_s19, %s1355_s20  }
  0x38   :  { %1339 = dma.done.wait [#allocation3], 128  }
  0x39   :  { %1340 = vsyncadd [#allocation3], 4294967168 }
  0x3a   :  { %1341 = dma.done.wait [#allocation6], 6144  }
  0x3b   :  { %1342 = vsyncadd [#allocation6], 4294961152 }
  0x3c   :  { %1343 = dma.done.wait [#allocation9], 6144  }
  0x3d   :  { %1344 = vsyncadd [#allocation9], 4294961152  ;;  %v1356_v0 = vmov 0   ;;  %v1083_v1 = vld [vmem:[#allocation5 + $0x74] ss:$8 sps:$4 sm:$0xff]  }
  0x3e   :  { %241 = vmatprep.mubr.bf16.mxu0 %v1356_v0  ;;  %v1085_v2 = vld [vmem:[#allocation5 + $0x70] ss:$8 sps:$4 sm:$0xff]   ;;  %209 = vmatprep.subr.bf16.mxu0 %v1083_v1  ;;  %v1086_v3 = vld [vmem:[#allocation5 + $0x64] ss:$8 sps:$4 sm:$0xff]   ;;  %v1088_v4 = vld [vmem:[#allocation5 + $0x60] ss:$8 sps:$4 sm:$0xff]  }
  0x3f   :  { %210 = vmatpush1.bf16.msra.mxu0 %v1085_v2  ;;  %v1089_v5 = vld [vmem:[#allocation5 + $0x54] ss:$8 sps:$4 sm:$0xff]   ;;  %v1091_v6 = vld [vmem:[#allocation5 + $0x50] ss:$8 sps:$4 sm:$0xff]   ;;  %v1092_v7 = vld [vmem:[#allocation5 + $0x44] ss:$8 sps:$4 sm:$0xff]  }
  0x40   :  { %211 = vmatprep.subr.bf16.mxu0 %v1086_v3  ;;  %v1094_v8 = vld [vmem:[#allocation5 + $0x40] ss:$8 sps:$4 sm:$0xff]   ;;  %v1095_v9 = vld [vmem:[#allocation5 + $0x34] ss:$8 sps:$4 sm:$0xff]   ;;  %v1109_v11 = vld [vmem:[#allocation7 + $0x70] ss:$8 sps:$4 sm:$0xff]  }
  0x41   :  { %v1107_v10 = vld [vmem:[#allocation7 + $0x74] ss:$8 sps:$4 sm:$0xff]   ;;  %v1110_v12 = vld [vmem:[#allocation7 + $0x64] ss:$8 sps:$4 sm:$0xff]   ;;  %v1097_v13 = vld [vmem:[#allocation5 + $0x30] ss:$8 sps:$4 sm:$0xff]  }
  0x42   :  { %464 = vmatprep.subr.bf16.mxu1 %v1107_v10  ;;  %v1112_v14 = vld [vmem:[#allocation7 + $0x60] ss:$8 sps:$4 sm:$0xff]   ;;  %v1113_v15 = vld [vmem:[#allocation7 + $0x54] ss:$8 sps:$4 sm:$0xff]   ;;  %v1098_v16 = vld [vmem:[#allocation5 + $0x24] ss:$8 sps:$4 sm:$0xff]  }
  0x43   :  { %212 = vmatpush1.bf16.msra.mxu0 %v1088_v4  ;;  %465 = vmatpush1.bf16.msra.mxu1 %v1109_v11  ;;  %v1100_v17 = vld [vmem:[#allocation5 + $0x20] ss:$8 sps:$4 sm:$0xff]   ;;  %v1115_v18 = vld [vmem:[#allocation7 + $0x50] ss:$8 sps:$4 sm:$0xff]   ;;  %v1116_v19 = vld [vmem:[#allocation7 + $0x44] ss:$8 sps:$4 sm:$0xff]  }
  0x44   :  { %213 = vmatprep.subr.bf16.mxu0 %v1089_v5  ;;  %466 = vmatprep.subr.bf16.mxu1 %v1110_v12  ;;  %v1101_v20 = vld [vmem:[#allocation5 + $0x14] ss:$8 sps:$4 sm:$0xff]   ;;  %v1103_v21 = vld [vmem:[#allocation5 + $0x10] ss:$8 sps:$4 sm:$0xff]   ;;  %v1118_v22 = vld [vmem:[#allocation7 + $0x40] ss:$8 sps:$4 sm:$0xff]  }
  0x45   :  { %v1119_v23 = vld [vmem:[#allocation7 + $0x34] ss:$8 sps:$4 sm:$0xff]   ;;  %v1104_v24 = vld [vmem:[#allocation5 + $0x4] ss:$8 sps:$4 sm:$0xff]   ;;  %v1106_v25 = vld [vmem:[#allocation5] ss:$8 sps:$4 sm:$0xff]  }
  0x46   :  { %v92_v26 = vld [vmem:[#allocation2] sm:$0xff]  ;;  %v1122_v28 = vld [vmem:[#allocation7 + $0x24] ss:$8 sps:$4 sm:$0xff]   ;;  %v1124_v29 = vld [vmem:[#allocation7 + $0x20] ss:$8 sps:$4 sm:$0xff]  }
  0x47   :  { %214 = vmatpush1.bf16.msra.mxu0 %v1091_v6  ;;  %467 = vmatpush1.bf16.msra.mxu1 %v1112_v14  ;;  %v1121_v27 = vld [vmem:[#allocation7 + $0x30] ss:$8 sps:$4 sm:$0xff]   ;;  %v1125_v30 = vld [vmem:[#allocation7 + $0x14] ss:$8 sps:$4 sm:$0xff]   ;;  %v93_v31 = vpack.c.bf16 %v92_v26, %v92_v26  ;;  %v1128_v33 = vld [vmem:[#allocation7 + $0x4] ss:$8 sps:$4 sm:$0xff]  }
  0x48   :  { %215 = vmatprep.subr.bf16.mxu0 %v1092_v7  ;;  %468 = vmatprep.subr.bf16.mxu1 %v1113_v15  ;;  %v1127_v32 = vld [vmem:[#allocation7 + $0x10] ss:$8 sps:$4 sm:$0xff]   ;;  %v1130_v34 = vld [vmem:[#allocation7] ss:$8 sps:$4 sm:$0xff]   ;;  %v1131_v35 = vld [vmem:[#allocation7 + $0xf4] ss:$8 sps:$4 sm:$0xff]   ;;  %v111_v15 = vlaneseq }
  0x49   :  { %v1133_v36 = vld [vmem:[#allocation7 + $0xf0] ss:$8 sps:$4 sm:$0xff]   ;;  %v1134_v37 = vld [vmem:[#allocation7 + $0xe4] ss:$8 sps:$4 sm:$0xff]   ;;  %v1136_v38 = vld [vmem:[#allocation7 + $0xe0] ss:$8 sps:$4 sm:$0xff]  }
  0x4a   :  { %v1137_v39 = vld [vmem:[#allocation7 + $0xd4] ss:$8 sps:$4 sm:$0xff]   ;;  %v1139_v40 = vld [vmem:[#allocation7 + $0xd0] ss:$8 sps:$4 sm:$0xff]   ;;  %v1140_v41 = vld [vmem:[#allocation7 + $0xc4] ss:$8 sps:$4 sm:$0xff]  }
  0x4b   :  { %216 = vmatpush1.bf16.msra.mxu0 %v1094_v8  ;;  %469 = vmatpush1.bf16.msra.mxu1 %v1115_v18  ;;  %v1142_v42 = vld [vmem:[#allocation7 + $0xc0] ss:$8 sps:$4 sm:$0xff]   ;;  %v1143_v43 = vld [vmem:[#allocation7 + $0xb4] ss:$8 sps:$4 sm:$0xff]   ;;  %v1145_v44 = vld [vmem:[#allocation7 + $0xb0] ss:$8 sps:$4 sm:$0xff]  }
  0x4c   :  { %217 = vmatprep.subr.bf16.mxu0 %v1095_v9  ;;  %470 = vmatprep.subr.bf16.mxu1 %v1116_v19  ;;  %v1146_v45 = vld [vmem:[#allocation7 + $0xa4] ss:$8 sps:$4 sm:$0xff]   ;;  %v1148_v46 = vld [vmem:[#allocation7 + $0xa0] ss:$8 sps:$4 sm:$0xff]   ;;  %v1149_v47 = vld [vmem:[#allocation7 + $0x94] ss:$8 sps:$4 sm:$0xff]  }
  0x4d   :  { %v1151_v48 = vld [vmem:[#allocation7 + $0x90] ss:$8 sps:$4 sm:$0xff]   ;;  %v1152_v49 = vld [vmem:[#allocation7 + $0x84] ss:$8 sps:$4 sm:$0xff]   ;;  %v1154_v50 = vld [vmem:[#allocation7 + $0x80] ss:$8 sps:$4 sm:$0xff]  }
  0x4e   :  { %v1155_v51 = vld [vmem:[#allocation8 + $0x70] ss:$8 sps:$4 sm:$0xff]   ;;  %v1157_v52 = vld [vmem:[#allocation8 + $0x74] ss:$8 sps:$4 sm:$0xff]   ;;  %v1160_v53 = vld [vmem:[#allocation8 + $0x64] ss:$8 sps:$4 sm:$0xff]  }
  0x4f   :  { %218 = vmatpush1.bf16.msra.mxu0 %v1097_v13  ;;  %471 = vmatpush1.bf16.msra.mxu1 %v1118_v22  ;;  %v1158_v54 = vld [vmem:[#allocation8 + $0x60] ss:$8 sps:$4 sm:$0xff]   ;;  %v1163_v55 = vld [vmem:[#allocation8 + $0x54] ss:$8 sps:$4 sm:$0xff]   ;;  %v1161_v56 = vld [vmem:[#allocation8 + $0x50] ss:$8 sps:$4 sm:$0xff]  }
  0x50   :  { %219 = vmatprep.subr.bf16.mxu0 %v1098_v16  ;;  %472 = vmatprep.subr.bf16.mxu1 %v1119_v23  ;;  %v1166_v57 = vld [vmem:[#allocation8 + $0x44] ss:$8 sps:$4 sm:$0xff]   ;;  %v1164_v58 = vld [vmem:[#allocation8 + $0x40] ss:$8 sps:$4 sm:$0xff]   ;;  %v1169_v59 = vld [vmem:[#allocation8 + $0x34] ss:$8 sps:$4 sm:$0xff]  }
  0x51   :  { %v1167_v60 = vld [vmem:[#allocation8 + $0x30] ss:$8 sps:$4 sm:$0xff]   ;;  %v1172_v61 = vld [vmem:[#allocation8 + $0x24] ss:$8 sps:$4 sm:$0xff]   ;;  %v1170_v62 = vld [vmem:[#allocation8 + $0x20] ss:$8 sps:$4 sm:$0xff]  }
  0x52   :  { %v1175_v63 = vld [vmem:[#allocation8 + $0x14] ss:$8 sps:$4 sm:$0xff]   ;;  %v1173_v0 = vld [vmem:[#allocation8 + $0x10] ss:$8 sps:$4 sm:$0xff]   ;;  %v1178_v1 = vld [vmem:[#allocation8 + $0x4] ss:$8 sps:$4 sm:$0xff]  }
  0x53   :  { %220 = vmatpush1.bf16.msra.mxu0 %v1100_v17  ;;  %473 = vmatpush1.bf16.msra.mxu1 %v1121_v27  ;;  %v1176_v2 = vld [vmem:[#allocation8] ss:$8 sps:$4 sm:$0xff]   ;;  %v1181_v3 = vld [vmem:[#allocation8 + $0xf4] ss:$8 sps:$4 sm:$0xff]   ;;  %v1179_v4 = vld [vmem:[#allocation8 + $0xf0] ss:$8 sps:$4 sm:$0xff]  }
  0x54   :  { %221 = vmatprep.subr.bf16.mxu0 %v1101_v20  ;;  %474 = vmatprep.subr.bf16.mxu1 %v1122_v28  ;;  %v1184_v5 = vld [vmem:[#allocation8 + $0xe4] ss:$8 sps:$4 sm:$0xff]   ;;  %v1182_v6 = vld [vmem:[#allocation8 + $0xe0] ss:$8 sps:$4 sm:$0xff]   ;;  %v1187_v7 = vld [vmem:[#allocation8 + $0xd4] ss:$8 sps:$4 sm:$0xff]  }
  0x55   :  { %v1185_v8 = vld [vmem:[#allocation8 + $0xd0] ss:$8 sps:$4 sm:$0xff]   ;;  %v1190_v9 = vld [vmem:[#allocation8 + $0xc4] ss:$8 sps:$4 sm:$0xff]   ;;  %v1188_v10 = vld [vmem:[#allocation8 + $0xc0] ss:$8 sps:$4 sm:$0xff]  }
  0x56   :  { %v1193_v11 = vld [vmem:[#allocation8 + $0xb4] ss:$8 sps:$4 sm:$0xff]   ;;  %v1191_v12 = vld [vmem:[#allocation8 + $0xb0] ss:$8 sps:$4 sm:$0xff]   ;;  %v1196_v13 = vld [vmem:[#allocation8 + $0xa4] ss:$8 sps:$4 sm:$0xff]  }
  0x57   :  { %222 = vmatpush1.bf16.msra.mxu0 %v1103_v21  ;;  %475 = vmatpush1.bf16.msra.mxu1 %v1124_v29  ;;  %v1194_v14 = vld [vmem:[#allocation8 + $0xa0] ss:$8 sps:$4 sm:$0xff]   ;;  %v1417_v16 = vshrl.u32 %v111_v15, 7  ;;  %v1423_v18 = vld [vmem:[%s1446_s5] sm:$0xff]  ;;  %s1357_s5 = smov [#allocation11]  }
  0x58   :  { %223 = vmatprep.subr.bf16.mxu0 %v1104_v24  ;;  %476 = vmatprep.subr.bf16.mxu1 %v1125_v30  ;;  %s943_s23 = sshll.u32 %s1357_s5, 4  ;;  %s944_s23 = int_to_ptr.vmem [resolvable:$true] %s943_s23 }
  0x59   :  { %v113_v17 = vsub.s32 0, %v1417_v16  ;;  %v117_v19 = vsub.s32 4, %v1417_v16  ;;  %s1319_s24 = scalar_lea.vmem %s944_s23, 128  ;;  %p1324_p12 = scmp.lt.s32.totalorder %s944_s23, %s944_s23 }
  0x5a   :  { %p1320_p11 = scmp.ne.s32.totalorder %s944_s23, %s1319_s24  ;;  %p1325_p13 = scmp.lt.s32.totalorder %s1319_s24, %s1319_s24 }
  0x5b   :  { %224 = vmatpush1.bf16.msra.mxu0 %v1106_v25  ;;  %477 = vmatpush1.bf16.msra.mxu1 %v1127_v32  ;;  %v114_v20 = vrot.slane %v1423_v18, %v113_v17  ;;  %v118_v21 = vrot.slane %v1423_v18, %v117_v19 }
  0x5c   :  { %478 = vmatprep.subr.bf16.mxu1 %v1128_v33  ;;  %719 = vmatprep.subr.bf16.mxu0 %v1157_v52  ;;  %p1326_p0 = por %p1325_p13, %p1324_p12 }
  0x5d   :  { %v124_v22 = vrot.slane %v114_v20, %v113_v17  ;;  %v128_v23 = vrot.slane %v118_v21, %v113_v17 }
  0x5e   :  { %242 = vmatmul.mubr.bf16.vlgmr.msra.gmra.mxu0 %v93_v31  ;;  %p1327_p1 = pnand %p1326_p0, %p1320_p11 }
  0x5f   :  { %479 = vmatpush1.bf16.msra.mxu1 %v1130_v34  ;;  %720 = vmatpush1.bf16.msra.mxu0 %v1155_v51  ;;  %v1199_v34 = vld [vmem:[#allocation8 + $0x94] ss:$8 sps:$4 sm:$0xff]   ;;  %v292_v51 = vsub.s32 5, %v1417_v16 }
  0x60   :  { %480 = vmatprep.subr.bf16.mxu1 %v1131_v35  ;;  %721 = vmatprep.subr.bf16.mxu0 %v1160_v53  ;;  %v1197_v35 = vld [vmem:[#allocation8 + $0x90] ss:$8 sps:$4 sm:$0xff]  }
  0x61   :  { %v293_v53 = vrot.slane %v1423_v18, %v292_v51 }
  0x63   :  { %481 = vmatpush2.bf16.msra.mxu1 %v1133_v36  ;;  %722 = vmatpush1.bf16.msra.mxu0 %v1158_v54  ;;  %v1202_v36 = vld [vmem:[#allocation8 + $0x84] ss:$8 sps:$4 sm:$0xff]  }
  0x64   :  { %482 = vmatprep.subr.bf16.mxu1 %v1134_v37  ;;  %723 = vmatprep.subr.bf16.mxu0 %v1163_v55  ;;  %v1200_v37 = vld [vmem:[#allocation8 + $0x80] ss:$8 sps:$4 sm:$0xff]  }
  0x67   :  { %483 = vmatpush2.bf16.msra.mxu1 %v1136_v38  ;;  %724 = vmatpush1.bf16.msra.mxu0 %v1161_v56  ;;  %v1203_v38 = vld [vmem:[#allocation10 + $0x78] sm:$0xff]  }
  0x68   :  { %484 = vmatprep.subr.bf16.mxu1 %v1137_v39  ;;  %725 = vmatprep.subr.bf16.mxu0 %v1166_v57  ;;  %v1204_v39 = vld [vmem:[#allocation10 + $0x38] sm:$0xff]  }
  0x6b   :  { %485 = vmatpush2.bf16.msra.mxu1 %v1139_v40  ;;  %726 = vmatpush1.bf16.msra.mxu0 %v1164_v58  ;;  %v1205_v40 = vld [vmem:[#allocation10 + $0x70] sm:$0xff]  }
  0x6c   :  { %486 = vmatprep.subr.bf16.mxu1 %v1140_v41  ;;  %727 = vmatprep.subr.bf16.mxu0 %v1169_v59  ;;  %v1206_v41 = vld [vmem:[#allocation10 + $0x30] sm:$0xff]  }
  0x6f   :  { %487 = vmatpush2.bf16.msra.mxu1 %v1142_v42  ;;  %728 = vmatpush1.bf16.msra.mxu0 %v1167_v60  ;;  %v1207_v42 = vld [vmem:[#allocation10 + $0x68] sm:$0xff]  }
  0x70   :  { %488 = vmatprep.subr.bf16.mxu1 %v1143_v43  ;;  %729 = vmatprep.subr.bf16.mxu0 %v1172_v61  ;;  %v1208_v43 = vld [vmem:[#allocation10 + $0x28] sm:$0xff]  }
  0x73   :  { %489 = vmatpush2.bf16.msra.mxu1 %v1145_v44  ;;  %730 = vmatpush1.bf16.msra.mxu0 %v1170_v62  ;;  %v1209_v44 = vld [vmem:[#allocation10 + $0x60] sm:$0xff]  }
  0x74   :  { %490 = vmatprep.subr.bf16.mxu1 %v1146_v45  ;;  %731 = vmatprep.subr.bf16.mxu0 %v1175_v63  ;;  %v1210_v45 = vld [vmem:[#allocation10 + $0x20] sm:$0xff]  }
  0x77   :  { %491 = vmatpush2.bf16.msra.mxu1 %v1148_v46  ;;  %732 = vmatpush1.bf16.msra.mxu0 %v1173_v0  ;;  %v1211_v46 = vld [vmem:[#allocation10 + $0x58] sm:$0xff]  }
  0x78   :  { %492 = vmatprep.subr.bf16.mxu1 %v1149_v47  ;;  %733 = vmatprep.subr.bf16.mxu0 %v1178_v1  ;;  %v1212_v47 = vld [vmem:[#allocation10 + $0x18] sm:$0xff]  }
  0x7b   :  { %493 = vmatpush2.bf16.msra.mxu1 %v1151_v48  ;;  %734 = vmatpush1.bf16.msra.mxu0 %v1176_v2  ;;  %v1213_v48 = vld [vmem:[#allocation10 + $0x50] sm:$0xff]   ;;  %v1215_v2 = vld [vmem:[#allocation10 + $0x48] sm:$0xff]  }
  0x7c   :  { %494 = vmatprep.subr.bf16.mxu1 %v1152_v49  ;;  %735 = vmatprep.subr.bf16.mxu0 %v1181_v3  ;;  %v1214_v49 = vld [vmem:[#allocation10 + $0x10] sm:$0xff]   ;;  %v1216_v3 = vld [vmem:[#allocation10 + $0x8] sm:$0xff]  }
  0x7f   :  { %495 = vmatpush2.bf16.msra.mxu1 %v1154_v50  ;;  %736 = vmatpush2.bf16.msra.mxu0 %v1179_v4  ;;  %v288_v50 = vsub.s32 1, %v1417_v16  ;;  %v1217_v4 = vld [vmem:[#allocation10 + $0x40] sm:$0xff]  }
  0x80   :  { %737 = vmatprep.subr.bf16.mxu0 %v1184_v5  ;;  %1050 = vmatprep.subr.bf16.mxu1 %v1203_v38  ;;  %v1218_v5 = vld [vmem:[#allocation10] sm:$0xff]  }
  0x81   :  { %v289_v52 = vrot.slane %v1423_v18, %v288_v50  ;;  %v303_v55 = vrot.slane %v293_v53, %v288_v50 }
  0x83   :  { %738 = vmatpush2.bf16.msra.mxu0 %v1182_v6  ;;  %v299_v54 = vrot.slane %v289_v52, %v288_v50  ;;  %v543_v6 = vsub.s32 2, %v1417_v16 }
  0x84   :  { %739 = vmatprep.subr.bf16.mxu0 %v1187_v7  ;;  %v547_v7 = vsub.s32 6, %v1417_v16 }
  0x87   :  { %740 = vmatpush2.bf16.msra.mxu0 %v1185_v8  ;;  %v544_v8 = vrot.slane %v1423_v18, %v543_v6 }
  0x88   :  { %741 = vmatprep.subr.bf16.mxu0 %v1190_v9  ;;  %v548_v9 = vrot.slane %v1423_v18, %v547_v7 }
  0x8b   :  { %742 = vmatpush2.bf16.msra.mxu0 %v1188_v10  ;;  %v554_v10 = vrot.slane %v544_v8, %v543_v6 }
  0x8c   :  { %743 = vmatprep.subr.bf16.mxu0 %v1193_v11  ;;  %v558_v11 = vrot.slane %v548_v9, %v543_v6 }
  0x8f   :  { %744 = vmatpush2.bf16.msra.mxu0 %v1191_v12 }
  0x90   :  { %745 = vmatprep.subr.bf16.mxu0 %v1196_v13 }
  0x93   :  { %746 = vmatpush2.bf16.msra.mxu0 %v1194_v14 }
  0x94   :  { %747 = vmatprep.subr.bf16.mxu0 %v1199_v34 }
  0x97   :  { %748 = vmatpush2.bf16.msra.mxu0 %v1197_v35 }
  0x98   :  { %749 = vmatprep.subr.bf16.mxu0 %v1202_v36 }
  0x9b   :  { %750 = vmatpush2.bf16.msra.mxu0 %v1200_v37 }
 0x11e   :  { %v243_v24 = vpop.f32.mrf.mxu0 }
 0x11f   :  { %v244_v25 = vadd.f32 %v243_v24, %v124_v22  ;;  %v798_v24 = vsub.s32 3, %v1417_v16 }
 0x120   :  { %v245_v26 = vpop.f32.mrf.mxu0 }
 0x121   :  { %v246_v27 = vadd.f32 %v245_v26, %v128_v23  ;;  %v250_v28 = vmax.f32 %v244_v25, 0.0  ;;  %v799_v26 = vrot.slane %v1423_v18, %v798_v24 }
 0x122   :  { %v247_v29 = vpop.f32.mrf.mxu0 }
 0x123   :  { %v251_v30 = vmax.f32 %v246_v27, 0.0  ;;  %v252_v33 = vpack.c.bf16 %v250_v28, %v250_v28 }
 0x124   :  { %v248_v31 = vpop.f32.mrf.mxu0 }
 0x125   :  { %v253_v32 = vpack.c.bf16 %v251_v30, %v251_v30 }
 0x127   :  { %496 = vmatprep.mubr.bf16.mxu1 %v253_v32 }
 0x128   :  { %497 = vmatmul.mubr.bf16.vlgmr.msra.gmra.mxu1 %v252_v33 }
 0x129   :  { %1051 = vmatpush3.bf16.msra.mxu1 %v1204_v39 }
 0x12a   :  { %1052 = vmatprep.subr.bf16.mxu1 %v1205_v40 }
 0x12d   :  { %1053 = vmatpush3.bf16.msra.mxu1 %v1206_v41 }
 0x12e   :  { %1054 = vmatprep.subr.bf16.mxu1 %v1207_v42 }
 0x131   :  { %1055 = vmatpush3.bf16.msra.mxu1 %v1208_v43 }
 0x132   :  { %1056 = vmatprep.subr.bf16.mxu1 %v1209_v44 }
 0x135   :  { %1057 = vmatpush3.bf16.msra.mxu1 %v1210_v45 }
 0x136   :  { %1058 = vmatprep.subr.bf16.mxu1 %v1211_v46 }
 0x139   :  { %1059 = vmatpush3.bf16.msra.mxu1 %v1212_v47 }
 0x13a   :  { %1060 = vmatprep.subr.bf16.mxu1 %v1213_v48 }
 0x13d   :  { %1061 = vmatpush3.bf16.msra.mxu1 %v1214_v49 }
 0x13e   :  { %1062 = vmatprep.subr.bf16.mxu1 %v1215_v2 }
 0x141   :  { %1063 = vmatpush3.bf16.msra.mxu1 %v1216_v3 }
 0x142   :  { %1064 = vmatprep.subr.bf16.mxu1 %v1217_v4 }
 0x145   :  { %1065 = vmatpush3.bf16.msra.mxu1 %v1218_v5 }
 0x1e8   :  { %v498_v56 = vpop.f32.mrf.mxu1 }
 0x1e9   :  { %v499_v57 = vadd.f32 %v498_v56, %v299_v54 }
 0x1ea   :  { %v500_v58 = vpop.f32.mrf.mxu1 }
 0x1eb   :  { %v501_v59 = vadd.f32 %v500_v58, %v303_v55  ;;  %v505_v60 = vmax.f32 %v499_v57, 0.0 }
 0x1ec   :  { %v502_v61 = vpop.f32.mrf.mxu1 }
 0x1ed   :  { %v506_v62 = vmax.f32 %v501_v59, 0.0  ;;  %v507_v1 = vpack.c.bf16 %v505_v60, %v505_v60 }
 0x1ee   :  { %v503_v63 = vpop.f32.mrf.mxu1 }
 0x1ef   :  { %v508_v0 = vpack.c.bf16 %v506_v62, %v506_v62 }
 0x1f1   :  { %751 = vmatprep.mubr.bf16.mxu0 %v508_v0 }
 0x1f2   :  { %752 = vmatmul.mubr.bf16.vlgmr.msra.gmra.mxu0 %v507_v1 }
 0x2b2   :  { %v753_v12 = vpop.f32.mrf.mxu0 }
 0x2b3   :  { %v754_v13 = vadd.f32 %v753_v12, %v554_v10 }
 0x2b4   :  { %v755_v14 = vpop.f32.mrf.mxu0 }
 0x2b5   :  { %v756_v15 = vadd.f32 %v755_v14, %v558_v11  ;;  %v760_v17 = vmax.f32 %v754_v13, 0.0 }
 0x2b6   :  { %v757_v19 = vpop.f32.mrf.mxu0 }
 0x2b7   :  { %v761_v20 = vmax.f32 %v756_v15, 0.0  ;;  %v762_v23 = vpack.c.bf16 %v760_v17, %v760_v17 }
 0x2b8   :  { %v758_v21 = vpop.f32.mrf.mxu0 }
 0x2b9   :  { %v763_v22 = vpack.c.bf16 %v761_v20, %v761_v20 }
 0x2bb   :  { %928 = vmatprep.mubr.bf16.mxu1 %v763_v22 }
 0x2bc   :  { %929 = vmatmul.mubr.bf16.vlgmr.msra.gmra.mxu1 %v762_v23 }
 0x37c   :  { %v1066_v25 = vpop.f32.mrf.mxu1 }
 0x37e   :  { %v1067_v27 = vpop.f32.mrf.mxu1 }
 0x37f   :  { %v1068_v28 = vadd.f32 %v1067_v27, %v1066_v25 }
 0x380   :  { %v1069_v29 = vpop.f32.mrf.mxu1 }
 0x381   :  { %v931_v30 = vadd.f32 %v1068_v28, %v799_v26 }
 0x382   :  { %v1070_v31 = vpop.f32.mrf.mxu1 }
 0x383   :  { %936 = vst [vmem:[#allocation11] sm:$0xff] %v931_v30 }
 0x384   :  { %1330 = shalt.err (!%p1327_p1)
}
 0x385   :  { %946 = dma.vmem_to_hbm [thread:$0]  %s944_s23, 128, %s1447_s6, [#allocation4]  }
 0x386   :  { %1345 = dma.done.wait [#allocation4], 128  }
 0x387   :  { %1346 = vsyncadd [#allocation4], 4294967168 }
 0x388   :  { %950 = vsyncpa [#allocation3], 1 }
 0x389   :  { %951 = vsyncpa [#allocation6], 1 }
 0x38a   :  { %952 = vsyncpa [#allocation9], 1 }
 0x38b   :  { %953 = vsyncpa [#allocation4], 1 }

</bundles_post_ra>
